<compile_context>
chip_gen: v5e
topology: v5e:2x2
jax: 0.10.0
libtpu: 0.0.40
codegen_flags: <defaults>
</compile_context>

<pallas_src>
import functools

import jax
import jax.numpy as jnp
from jax.experimental import pallas as pl
from jax.experimental.pallas import tpu as pltpu


def _rmsnorm_kernel(x_ref, w_ref, o_ref, *, eps: float):
    # x_ref: (tile_rows, dim), w_ref: (1, dim), o_ref: (tile_rows, dim)
    x_in = x_ref[...]
    x = x_in.astype(jnp.float32)                        # x.float()
    ms = jnp.mean(x * x, axis=-1, keepdims=True)        # pow(2).mean(-1, keepdim=True)
    normed = x * jax.lax.rsqrt(ms + eps)                # x * rsqrt(ms + eps)
    normed = normed.astype(x_in.dtype)                  # .type_as(x)
    o_ref[...] = (normed * w_ref[...]).astype(o_ref.dtype)   # * self.weight


def _sublane_rows(dtype) -> int:
    # Rows per vreg along the sublane axis: 8 for 4-byte, 16 for 2-byte, 32 for 1-byte.
    return max(8, 32 // jnp.dtype(dtype).itemsize)


def _round_up(n: int, m: int) -> int:
    return -(-n // m) * m


def rmsnorm(x: jax.Array, weight: jax.Array, eps: float = 1e-6,
            tile_rows: int | None = None, out_dtype=None) -> jax.Array:
    """RMSNorm over the last axis of x. weight has shape (dim,)."""
    orig_shape = x.shape
    dim = orig_shape[-1]
    x2d = x.reshape(-1, dim)
    n_rows = x2d.shape[0]

    # Output dtype follows PyTorch promotion: normed (x.dtype) * weight.
    if out_dtype is None:
        out_dtype = jnp.promote_types(x.dtype, weight.dtype)
    w2d = weight.reshape(1, dim)

    in_bytes = jnp.dtype(x.dtype).itemsize
    out_bytes = jnp.dtype(out_dtype).itemsize
    sublane = max(_sublane_rows(x.dtype), _sublane_rows(out_dtype))

    if tile_rows is None:
        # Double-buffered input + double-buffered output per pipeline stage.
        bytes_per_row = dim * 2 * (in_bytes + out_bytes)
        vmem_budget = 40 << 20                   # stays inside v7x's 64 MiB per-TC VMEM
        tile_rows = min(1024, max(1, vmem_budget // max(1, bytes_per_row)))
        # Never tile larger than the (sublane-rounded) work that actually exists.
        tile_rows = min(tile_rows, _round_up(n_rows, sublane))
        # Keep at least 2 grid steps when there is enough work, so v7x's two
        # TensorCores both get a share of the (parallel) row axis.
        if n_rows > sublane:
            half_rows = _round_up(-(-n_rows // 2), sublane)
            tile_rows = min(tile_rows, half_rows)
        tile_rows = max(sublane, (tile_rows // sublane) * sublane)
    else:
        tile_rows = max(sublane, _round_up(tile_rows, sublane))

    # Ragged row counts: pad with zero rows (zero rows normalize to zero; padded
    # region is sliced off afterwards).
    grid_rows = -(-n_rows // tile_rows)
    padded_rows = grid_rows * tile_rows
    if padded_rows != n_rows:
        x2d = jnp.pad(x2d, ((0, padded_rows - n_rows), (0, 0)))

    # Explicit scoped-VMEM limit: double-buffered in/out tiles + resident weight,
    # with headroom, clamped under v7x's physical 64 MiB.
    tile_bytes = tile_rows * dim * 2 * (in_bytes + out_bytes)
    tile_bytes += 2 * dim * jnp.dtype(weight.dtype).itemsize
    vmem_limit = int(tile_bytes * 1.25) + (2 << 20)
    vmem_limit = min(max(vmem_limit, 16 << 20), 56 << 20)

    out = pl.pallas_call(
        functools.partial(_rmsnorm_kernel, eps=eps),
        out_shape=jax.ShapeDtypeStruct((padded_rows, dim), out_dtype),
        grid_spec=pltpu.PrefetchScalarGridSpec(
            num_scalar_prefetch=0,
            grid=(grid_rows,),
            in_specs=[
                pl.BlockSpec((tile_rows, dim), lambda i: (i, 0)),
                pl.BlockSpec((1, dim), lambda i: (0, 0)),   # resident weight
            ],
            out_specs=pl.BlockSpec((tile_rows, dim), lambda i: (i, 0)),
        ),
        compiler_params=pltpu.CompilerParams(
            dimension_semantics=("parallel",),
            vmem_limit_bytes=vmem_limit),
    )(x2d, w2d)

    if padded_rows != n_rows:
        out = out[:n_rows]
    return out.reshape(orig_shape[:-1] + (dim,))


def _rmsnorm_ref(x, weight, eps):
    # Plain-JAX reference matching the PyTorch module exactly.
    xf = x.astype(jnp.float32)
    normed = xf * jax.lax.rsqrt(jnp.mean(xf * xf, axis=-1, keepdims=True) + eps)
    return normed.astype(x.dtype) * weight


if __name__ == "__main__":
    key = jax.random.PRNGKey(0)
    batch, seq, dim = 2, 8, 128   # lane-dense dim (multiple of 128)
    eps = 1e-6

    # Deterministic parameter init, matching nn.Parameter(torch.ones(dim)).
    weight = jnp.ones((dim,), dtype=jnp.float32)

    # f32 input.
    x = jax.random.normal(key, (batch, seq, dim), dtype=jnp.float32)
    out = jax.block_until_ready(rmsnorm(x, weight, eps=eps))
    ref = _rmsnorm_ref(x, weight, eps)
    assert out.shape == x.shape and out.dtype == ref.dtype
    assert jnp.allclose(out, ref, atol=1e-5, rtol=1e-5)

    # bf16 input with a ragged row count (exercises sublane=16 tiling + padding).
    xb = jax.random.normal(jax.random.PRNGKey(1), (3, 5, dim), dtype=jnp.bfloat16)
    outb = jax.block_until_ready(rmsnorm(xb, weight, eps=eps))
    refb = _rmsnorm_ref(xb, weight, eps)
    assert outb.shape == xb.shape and outb.dtype == refb.dtype
    assert jnp.allclose(outb.astype(jnp.float32), refb.astype(jnp.float32),
                        atol=2e-2, rtol=2e-2)

    print("KERNEL_OK")
</pallas_src>

<mosaic_0001>
module attributes {stable_mosaic.version = 11 : i64} {
  func.func @_rmsnorm_kernel(%arg0: i32, %arg1: memref<8x128xf32, #tpu.memory_space<vmem>>, %arg2: memref<1x128xf32, #tpu.memory_space<vmem>>, %arg3: memref<8x128xf32, #tpu.memory_space<vmem>>) attributes {dimension_semantics = [#tpu.dimension_semantics<parallel>], iteration_bounds = array<i64: 2>, scalar_prefetch = 0 : i64, scratch_operands = 0 : i64, tpu.core_type = #tpu.core_type<tc>, window_params = [{transform_indices = @transform_0, window_bounds = array<i64: 8, 128>}, {pipeline_mode = #tpu.pipeline_mode<synchronous>, transform_indices = @transform_1, window_bounds = array<i64: 1, 128>}, {transform_indices = @transform_2, window_bounds = array<i64: 8, 128>}]} {
    %c0 = arith.constant 0 : index
    %c0_0 = arith.constant 0 : index
    %0 = vector.load %arg1[%c0, %c0_0] : memref<8x128xf32, #tpu.memory_space<vmem>>, vector<8x128xf32>
    %1 = arith.mulf %0, %0 : vector<8x128xf32>
    %cst = arith.constant dense<0.000000e+00> : vector<8xf32>
    %2 = vector.multi_reduction <add>, %1, %cst [1] : vector<8x128xf32> to vector<8xf32>
    %3 = vector.shape_cast %2 : vector<8xf32> to vector<8x1xf32>
    %cst_1 = arith.constant 1.280000e+02 : f32
    %4 = vector.broadcast %cst_1 : f32 to vector<8x1xf32>
    %5 = arith.divf %3, %4 : vector<8x1xf32>
    %cst_2 = arith.constant 9.99999997E-7 : f32
    %6 = vector.broadcast %cst_2 : f32 to vector<8x1xf32>
    %7 = arith.addf %5, %6 : vector<8x1xf32>
    %8 = math.rsqrt %7 : vector<8x1xf32>
    %9 = vector.broadcast %8 : vector<8x1xf32> to vector<8x128xf32>
    %10 = arith.mulf %0, %9 : vector<8x128xf32>
    %c0_3 = arith.constant 0 : index
    %c0_4 = arith.constant 0 : index
    %11 = vector.load %arg2[%c0_3, %c0_4] : memref<1x128xf32, #tpu.memory_space<vmem>>, vector<1x128xf32>
    %12 = vector.broadcast %11 : vector<1x128xf32> to vector<8x128xf32>
    %13 = arith.mulf %10, %12 : vector<8x128xf32>
    %c0_5 = arith.constant 0 : index
    %c0_6 = arith.constant 0 : index
    %14 = vector.load %arg3[%c0_5, %c0_6] : memref<8x128xf32, #tpu.memory_space<vmem>>, vector<8x128xf32>
    tpu.vector_store %arg3[%c0_5, %c0_6], %13 {strides = array<i32>} : memref<8x128xf32, #tpu.memory_space<vmem>>, vector<8x128xf32>,
    return
  }
  func.func @transform_0(%arg0: i32) -> (i32, i32) {
    %c0_i32 = arith.constant 0 : i32
    %c0_i32_0 = arith.constant 0 : i32
    return %arg0, %c0_i32 : i32, i32
  }
  func.func @transform_1(%arg0: i32) -> (i32, i32) {
    %c0_i32 = arith.constant 0 : i32
    %c0_i32_0 = arith.constant 0 : i32
    %c0_i32_1 = arith.constant 0 : i32
    return %c0_i32, %c0_i32_0 : i32, i32
  }
  func.func @transform_2(%arg0: i32) -> (i32, i32) {
    %c0_i32 = arith.constant 0 : i32
    %c0_i32_0 = arith.constant 0 : i32
    return %arg0, %c0_i32 : i32, i32
  }
}

</mosaic_0001>

<bundles_post_ra>
// kernel: tpu_custom_call.1
= control target key start
LH: loop header
LB: loop body
LE: loop exit
PB: predicated region body
PF: predicated region fallthrough
CT: control target
= control target key end

     0   :  { %7 = vsyncpa [#allocation3], 0  ;;  %s670_s0 = inlined_call_operand.hbm [shape: f32[16,128], index: 0, kind: input, shape index: {}]   ;;  %s671_s1 = inlined_call_operand.hbm [shape: f32[1,128], index: 1, kind: input, shape index: {}]   ;;  %s672_s2 = inlined_call_operand.hbm [shape: f32[16,128], index: 2, kind: output, shape index: {}]  }
   0x1   :  { %9 = vsyncpa [#allocation3 + $0x1], 0 }
   0x2   :  { %10 = vsyncpa [#allocation6], 0 }
   0x3   :  { %11 = vsyncpa [#allocation4], 0 }
   0x4   :  { %13 = vsyncpa [#allocation4 + $0x1], 0  ;;  %s528_s9 = smov 0   ;;  %s530_s10 = smov 0  }
   0x5   :  { %s532_s11 = smov 0   ;;  %s534_s12 = smov 0  }
   0x6 LB: > { %s549_s13 = sadd.s32 4294967295, %s509_s12   ;;  %s302_s14 = sadd.s32 4294967294, %s509_s12   ;;  %s509_s12 = sphi %s534_s12, %s682_s12   ;;  %s505_s11 = sphi %s532_s11, %s681_s11   ;;  %s501_s10 = sphi %s530_s10, %s680_s10   ;;  %s497_s9 = sphi %s528_s9, %s679_s9  }
   0x7   : > { %p39_p0 = scmp.ne.s32.totalorder %s501_s10, %s497_s9  ;;  %p40_p1 = scmp.eq.s32.totalorder %s549_s13, 0 }
   0x8   : > { %p84_p2 = scmp.eq.s32.totalorder %s549_s13, 1  ;;  %p90_p3 = scmp.eq.s32.totalorder %s302_s14, 1 }
   0x9   : > { %p558_p4 = por %p40_p1, %p39_p0  ;;  %p303_p5 = scmp.ge.s32.totalorder %s509_s12, 1 }
   0xa   : > { %p563_p6 = por %p90_p3, %p39_p0  ;;  %p97_p7 = scmp.lt.s32.totalorder %s509_s12, 3 }
   0xb   : > { %s109_s19 = sshll.u32 %s671_s1, 4  ;;  %s511_s21 = smov [#allocation5]   ;;  %s110_s19 = int_to_ptr.hbm [resolvable:$true] %s109_s19 }
   0xc   : > { %p571_p8 = pnand %p303_p5, %p97_p7  ;;  %s111_s22 = sshll.u32 %s511_s21, 4  ;;  %s112_s22 = int_to_ptr.vmem [resolvable:$true] %s111_s22 }
   0xd   : > { %s581_s23 = sadd.s32 1, %s509_s12   ;;  %s26_s24 = sadd.s32 1, %s505_s11 }
   0xe   : > { %p324_p10 = pneg %p571_p8  ;;  %s23_s25 = ssub.s32 %s509_s12, %s581_s23 }
   0xf   : > { %p24_p12 = scmp.eq.s32.totalorder %s23_s25, 0  ;;  %p33_p13 = scmp.ne.s32.totalorder %s505_s11, %s501_s10 }
  0x10   : > { %p325_p11 = pnand %p324_p10, %p40_p1  ;;  %p34_p0 = scmp.eq.s32.totalorder %s509_s12, 0 }
  0x11   : > { %s590_s26 = scalar_select %p24_p12, %s505_s11, %s26_s24  }
  0x12   : > { %327 = dma.hbm_to_vmem [thread:$0]  (!%p325_p11), %s110_s19, 16, %s112_s22, [#allocation6]  }
  0x13   : > { %p594_p3 = por %p84_p2, %p33_p13  ;;  %p337_p5 = scmp.lt.s32.totalorder %s509_s12, 2 }
  0x14   : > { %s122_s28 = sand.u32 1, %s505_s11   ;;  %s307_s29 = sshll.u32 %s509_s12, 3 }
  0x15   : > { %p35_p7 = por %p34_p0, %p33_p13  ;;  %s306_s30 = sshll.u32 %s122_s28, 3 }
  0x16   : > { %s130_s5 = scalar_lea.hbm %s670_s0, %s307_s29  ;;  %s126_s7 = scalar_lea.vmem [#allocation2], %s306_s30 }
  0x17   : > { %s132_s6 = sshll.u32 %s130_s5, 4  ;;  %s134_s8 = sshll.u32 %s126_s7, 4  ;;  %s133_s6 = int_to_ptr.hbm [resolvable:$true] %s132_s6  ;;  %s135_s8 = int_to_ptr.vmem [resolvable:$true] %s134_s8 }
  0x18   : > { %p604_p10 = pnand %p337_p5, %p35_p7  ;;  %s123_s17 = scalar_lea.sflag [#allocation3], %s122_s28 }
  0x19   : > { %s409_s18 = sshra.s32 %s133_s6, 4  ;;  %s416_s24 = scalar_lea.hbm %s670_s0, 16  ;;  %s410_s18 = int_to_ptr.hbm [resolvable:$true] %s409_s18 }
  0x1a   : > { %s411_s19 = scalar_lea.hbm %s410_s18, 8  ;;  %p413_p11 = pneg %p604_p10 }
  0x1b   : > { %p412_p2 = scmp.ne.s32.totalorder %s410_s18, %s411_s19  ;;  %p417_p0 = scmp.lt.s32.totalorder %s410_s18, %s670_s0 }
  0x1c   : > { %p418_p5 = scmp.lt.s32.totalorder %s416_s24, %s411_s19 }
  0x1d   : > { %p414_p12 = pnand %p413_p11, %p412_p2 }
  0x1e   : > { %p419_p7 = por %p418_p5, %p417_p0 }
  0x1f   : > { %p415_p13 = pneg %p414_p12 }
  0x21   : > { %p420_p9 = pnand %p419_p7, %p415_p13 }
  0x23   : > { %423 = shalt.err (!%p420_p9)
}
  0x24   : > { %331 = dma.hbm_to_vmem [thread:$0]  (!%p604_p10), %s133_s6, 128, %s135_s8, %s123_s17  }
  0x25   : > { %143 = sbr.rel (%p571_p8) target bundleno = 193 (0xc1), region = 28  ;;  %s621_s28 = sand.u32 (!%p571_p8), 1, %s501_s10  }
  0x26   : > { %s309_s30 = sshll.u32 (!%p571_p8), %s621_s28, 3  ;;  %s146_s3 = scalar_lea.sflag (!%p571_p8), [#allocation3], %s621_s28 }
  0x27   : > { %s149_s4 = scalar_lea.vmem (!%p571_p8), [#allocation2], %s309_s30 }
  0x2a   : > { %484 = dma.done.wait (%p558_p4), %s146_s3, 128  }
  0x2b   : > { %486 = vsyncadd (%p558_p4), %s146_s3, 4294967168 }
  0x2c   : > { %488 = dma.done.wait (%p40_p1), [#allocation6], 16  }
  0x2d   : > { %490 = vsyncadd (%p40_p1), [#allocation6], 4294967280  ;;  %v176_v0 = vld [vmem:[%s149_s4] sm:$0xff]  ;;  %v512_v2 = vmov 128.0   ;;  %s313_s15 = sshll.u32 %s549_s13, 3  ;;  %s175_s7 = scalar_lea.vmem [#allocation7], %s309_s30 }
  0x2e   : > { %v177_v1 = vmul.f32 %v176_v0, %v176_v0  ;;  %375 = vrcp.f32 %v512_v2  ;;  %s217_s6 = scalar_lea.hbm %s672_s2, %s313_s15  ;;  %v374_v18 = vld [vmem:[#allocation5] ss:$0 sm:$0xff]  ;;  %s219_s8 = sshll.u32 %s175_s7, 4  ;;  %s220_s8 = int_to_ptr.vmem [resolvable:$true] %s219_s8 }
  0x2f   : > { %s221_s14 = sshll.u32 %s217_s6, 4  ;;  %s207_s13 = scalar_lea.sflag [#allocation4], %s621_s28  ;;  %s222_s14 = int_to_ptr.hbm [resolvable:$true] %s221_s14 }
  0x30   : > { %178 = vadd.xlane.f32.xlu0 %v177_v1  ;;  %s453_s17 = sshra.s32 %s222_s14, 4  ;;  %s459_s22 = scalar_lea.hbm %s672_s2, 16  ;;  %s454_s17 = int_to_ptr.hbm [resolvable:$true] %s453_s17 }
  0x31   : > { %s455_s18 = scalar_lea.hbm %s454_s17, 8  ;;  %p460_p9 = scmp.lt.s32.totalorder %s454_s17, %s672_s2 }
  0x32   : > { %p456_p1 = scmp.ne.s32.totalorder %s454_s17, %s455_s18  ;;  %p461_p10 = scmp.lt.s32.totalorder %s459_s22, %s455_s18 }
  0x34   : > { %v376_v3 = vpop.eup %375  ;;  %p457_p4 = pnand %p456_p1, %p594_p3  ;;  %p462_p2 = por %p461_p10, %p460_p9 }
  0x35   : > { %v181_v4 = vmul.f32 128.0, %v376_v3  ;;  %vm185_vm0 = vweird.f32 %v376_v3 }
  0x36   : > { %p458_p8 = pneg %p457_p4 }
  0x37   : > { %v182_v5 = vsub.f32 1.0, %v181_v4 }
  0x38   : > { %p463_p11 = pnand %p462_p2, %p458_p8 }
  0x39   : > { %v183_v6 = vmul.f32 %v376_v3, %v182_v5 }
  0x3b   : > { %v184_v7 = vadd.f32 %v376_v3, %v183_v6 }
  0x3d   : > { %v186_v8 = vsel %vm185_vm0, %v376_v3, %v184_v7 }
  0xa3   : > { %v179_v9 = vpop.xlane.xlu0 %178 }
  0xa4   : > { %v187_v10 = vmul.f32 %v186_v8, %v179_v9 }
  0xa6   : > { %v188_v11 = vadd.f32 1e-06, %v187_v10 }
  0xa8   : > { %377 = vrsqrt.f32 %v188_v11  ;;  %vm195_vm2 = vweird.f32 %v188_v11 }
  0xae   : > { %v378_v12 = vpop.eup %377 }
  0xaf   : > { %v190_v13 = vmul.f32 %v378_v12, %v188_v11  ;;  %vm196_vm1 = vweird.f32 %v378_v12 }
  0xb0   : > { %vm197_vm3 = vmor %vm195_vm2, %vm196_vm1 }
  0xb1   : > { %v191_v14 = vmul.f32 %v378_v12, %v190_v13 }
  0xb3   : > { %v192_v15 = vmul.f32 0.5, %v191_v14 }
  0xb5   : > { %v193_v16 = vsub.f32 1.5, %v192_v15 }
  0xb7   : > { %v194_v17 = vmul.f32 %v378_v12, %v193_v16 }
  0xb9   : > { %v198_v19 = vsel %vm197_vm3, %v378_v12, %v194_v17 }
  0xba   : > { %v199_v20 = vmul.f32 %v198_v19, %v176_v0 }
  0xbc   : > { %v204_v21 = vmul.f32 %v374_v18, %v199_v20 }
  0xbe   : > { %205 = vst [vmem:[%s175_s7] sm:$0xff] %v204_v21 }
  0xbf   : > { %466 = shalt.err (!%p463_p11)
}
  0xc0   : > { %322 = dma.vmem_to_hbm [thread:$0]  (%p594_p3), %s220_s8, 128, %s222_s14, %s207_s13  }
  0xc1 PF: > { %s233_s29 = sand.u32 1, %s497_s9   ;;  %p678_p12 = scmp.ge.s32.totalorder %s509_s12, 2 }
  0xc2   : > { %s234_s28 = scalar_lea.sflag [#allocation4], %s233_s29 }
  0xc3   : > { %p333_p13 = pnand %p678_p12, %p563_p6 }
  0xc5   : > { %p334_p0 = pneg %p333_p13 }
  0xc7   : > { %492 = dma.done.wait (%p334_p0), %s234_s28, 128  }
  0xc8   : > { %494 = vsyncadd (%p334_p0), %s234_s28, 4294967168  ;;  %p16_p5 = scmp.ge.s32.totalorder %s581_s23, 4   ;;  %s679_s9 = smov %s501_s10 }
  0xc9   : > { %s680_s10 = smov %s505_s11  ;;  %s681_s11 = smov %s590_s26 }
  0xca   : > { %s682_s12 = smov %s581_s23  ;;  %18 = sbr.rel (!%p16_p5) target bundleno = 6 (0x6), region = 77 }
  0xcf   :  { %240 = vsyncpa [#allocation3], 1 }
  0xd0   :  { %242 = vsyncpa [#allocation3 + $0x1], 1 }
  0xd1   :  { %243 = vsyncpa [#allocation6], 1 }
  0xd2   :  { %244 = vsyncpa [#allocation4], 1 }
  0xd3   :  { %246 = vsyncpa [#allocation4 + $0x1], 1 }

</bundles_post_ra>
